<compile_context>
chip_gen: v7x
topology: tpu7x:2x2x1
jax: 0.10.0
libtpu: 0.0.40
codegen_flags: <defaults>
</compile_context>

<pallas_src>
import jax
import jax.numpy as jnp
from jax import lax
from jax.experimental import pallas as pl
from jax.experimental.pallas import tpu as pltpu


def _mix32(x):
    # lowbias32 integer finalizer: u32 counter -> well-mixed u32 bits.
    x = x ^ (x >> 16)
    x = x * jnp.uint32(0x7FEB352D)
    x = x ^ (x >> 15)
    x = x * jnp.uint32(0x846CA68B)
    x = x ^ (x >> 16)
    return x


def _choose_layout(total, max_block_bytes=2 << 20):
    """Pick (lanes, rows, block_rows): wide lane-dense slabs, ~2 MiB blocks."""
    lanes = None
    # Prefer the widest lane count that also leaves rows a multiple of 8.
    for cand in (2048, 1024, 512, 256, 128):
        if total % cand == 0 and (total // cand) % 8 == 0:
            lanes = cand
            break
    if lanes is None:
        for cand in (2048, 1024, 512, 256, 128):
            if total % cand == 0:
                lanes = cand
                break
    if lanes is None:
        raise ValueError("flattened element count must be a multiple of 128")
    rows = total // lanes

    max_block_rows = max(8, max_block_bytes // (lanes * 4))
    if rows <= max_block_rows:
        block_rows = rows                      # single block == full extent
    else:
        block_rows = rows                      # safe fallback
        start = max_block_rows - (max_block_rows % 8)
        for d in range(start, 7, -8):          # largest multiple-of-8 divisor
            if rows % d == 0:
                block_rows = d
                break
    return lanes, rows, block_rows


def _make_kernel(use_hw_prng, approximate_gelu, block_rows, lanes):
    block_elems = block_rows * lanes

    def kernel(seed_ref, x1_ref, x2_ref, o_ref):
        x1 = x1_ref[...]
        x2 = x2_ref[...]
        pid = pl.program_id(0)

        # ---- one random draw covering both streams -------------------------
        if use_hw_prng:
            # Hardware PRNG: deterministic per block (seed + block id).
            pltpu.prng_seed(seed_ref[0] + pid)
            bits = pltpu.bitcast(pltpu.prng_random_bits(x1.shape), jnp.uint32)
        else:
            # Counter-based lowbias32 hash (fallback / interpret mode).
            r = lax.broadcasted_iota(jnp.int32, x1.shape, 0)
            col = lax.broadcasted_iota(jnp.int32, x1.shape, 1)
            local = (r * lanes + col).astype(jnp.uint32)
            blk_off = lax.convert_element_type(pid, jnp.uint32) * jnp.uint32(block_elems)
            seed_u = lax.convert_element_type(seed_ref[0], jnp.uint32)
            bits = _mix32(local + blk_off + seed_u)

        # c in [0,1): top 24 bits; its 2^-24 scale is folded together with the
        # dropout 1/(1-p)=2 rescale into a single 2^-23 constant below.
        cf = (bits >> 8).astype(jnp.int32).astype(jnp.float32)

        # dropout(p=0.5) keep mask from bit 7 of the same word (unused by c,
        # not one of the hash's weak lowest bits).
        keep = (bits & jnp.uint32(0x80)) == 0

        # a = x1*c ; b = a*x2 ; x4 = dropout(b)   (constants folded)
        x4 = jnp.where(keep,
                       x1 * x2 * cf * jnp.float32(1.0 / (1 << 23)),
                       jnp.float32(0.0))

        if approximate_gelu:
            # tanh-form GELU: transcendental goes to the EUP slot.
            c0 = jnp.float32(0.7978845608028654)   # sqrt(2/pi)
            c1 = jnp.float32(0.044715)
            inner = c0 * (x4 + c1 * x4 * x4 * x4)
            x5 = jnp.float32(0.5) * x4 * (jnp.float32(1.0) + jnp.tanh(inner))
        else:
            # exact GELU (PyTorch default): 0.5 * x * (1 + erf(x / sqrt(2)))
            inv_sqrt2 = jnp.float32(0.7071067811865476)
            x5 = jnp.float32(0.5) * x4 * (jnp.float32(1.0) + lax.erf(x4 * inv_sqrt2))

        o_ref[...] = x5.astype(o_ref.dtype)

    return kernel


def fused_forward(x1, x2, seed=0, approximate_gelu=False, use_hw_prng=None):
    assert x1.shape == x2.shape
    orig_shape = x1.shape
    orig_dtype = x1.dtype

    total = 1
    for d in orig_shape:
        total *= d

    lanes, rows, block_rows = _choose_layout(total)
    grid = rows // block_rows

    if use_hw_prng is None:
        use_hw_prng = jax.devices()[0].platform == "tpu"

    x1_2d = jnp.reshape(x1, (rows, lanes)).astype(jnp.float32)
    x2_2d = jnp.reshape(x2, (rows, lanes)).astype(jnp.float32)

    # Pre-mix the seed on the host (golden-ratio stride, kept non-negative for
    # an int32 SMEM scalar) so the kernel only does a broadcast add.
    seed_mix = (int(seed) * 0x9E3779B9) & 0x7FFFFFFF
    seed_arr = jnp.asarray([seed_mix], dtype=jnp.int32)

    kernel = _make_kernel(use_hw_prng, approximate_gelu, block_rows, lanes)

    out_2d = pl.pallas_call(
        kernel,
        out_shape=jax.ShapeDtypeStruct((rows, lanes), jnp.float32),
        grid=(grid,),
        in_specs=[
            pl.BlockSpec(memory_space=pltpu.MemorySpace.SMEM),          # seed
            pl.BlockSpec((block_rows, lanes), lambda i: (i, 0)),        # x1
            pl.BlockSpec((block_rows, lanes), lambda i: (i, 0)),        # x2
        ],
        out_specs=pl.BlockSpec((block_rows, lanes), lambda i: (i, 0)),
        compiler_params=pltpu.CompilerParams(
            dimension_semantics=("parallel",),
        ),
    )(seed_arr, x1_2d, x2_2d)

    return jnp.reshape(out_2d, orig_shape).astype(orig_dtype)


if __name__ == "__main__":
    key = jax.random.PRNGKey(0)
    k1, k2 = jax.random.split(key)
    # NCHW inputs: batch=2, channels=4, H=W=16
    x1 = jax.random.normal(k1, (2, 4, 16, 16), dtype=jnp.float32)
    x2 = jax.random.normal(k2, (2, 4, 16, 16), dtype=jnp.float32)

    out = fused_forward(x1, x2, seed=0)
    jax.block_until_ready(out)

    assert out.shape == x1.shape
    assert out.dtype == x1.dtype
    assert bool(jnp.all(jnp.isfinite(out)))
    print("KERNEL_OK")
</pallas_src>

<mosaic_0001>
module attributes {stable_mosaic.version = 11 : i64} {
  func.func @kernel(%arg0: i32, %arg1: memref<1xi32, #tpu.memory_space<smem>>, %arg2: memref<8x256xf32, #tpu.memory_space<vmem>>, %arg3: memref<8x256xf32, #tpu.memory_space<vmem>>, %arg4: memref<8x256xf32, #tpu.memory_space<vmem>>) attributes {dimension_semantics = [#tpu.dimension_semantics<parallel>], iteration_bounds = array<i64: 1>, scalar_prefetch = 0 : i64, scratch_operands = 0 : i64, tpu.core_type = #tpu.core_type<tc>, window_params = [{transform_indices = @transform_0, window_bounds = array<i64: 1>}, {transform_indices = @transform_1, window_bounds = array<i64: 8, 256>}, {transform_indices = @transform_2, window_bounds = array<i64: 8, 256>}, {transform_indices = @transform_3, window_bounds = array<i64: 8, 256>}]} {
    %c0 = arith.constant 0 : index
    %c0_0 = arith.constant 0 : index
    %0 = vector.load %arg2[%c0, %c0_0] : memref<8x256xf32, #tpu.memory_space<vmem>>, vector<8x256xf32>
    %c0_1 = arith.constant 0 : index
    %c0_2 = arith.constant 0 : index
    %1 = vector.load %arg3[%c0_1, %c0_2] : memref<8x256xf32, #tpu.memory_space<vmem>>, vector<8x256xf32>
    %2 = tpu.iota {dimensions = array<i32: 0>} : vector<8x256xi32>
    %3 = tpu.iota {dimensions = array<i32: 1>} : vector<8x256xi32>
    %c256_i32 = arith.constant 256 : i32
    %4 = vector.broadcast %c256_i32 : i32 to vector<8x256xi32>
    %5 = arith.muli %2, %4 : vector<8x256xi32>
    %6 = arith.addi %5, %3 : vector<8x256xi32>
    %c2048_i32 = arith.constant 2048 : i32
    %7 = arith.muli %arg0, %c2048_i32 : i32
    %c0_3 = arith.constant 0 : index
    %8 = memref.load %arg1[%c0_3] : memref<1xi32, #tpu.memory_space<smem>>
    %9 = vector.broadcast %7 : i32 to vector<8x256xi32>
    %10 = arith.addi %6, %9 : vector<8x256xi32>
    %11 = vector.broadcast %8 : i32 to vector<8x256xi32>
    %12 = arith.addi %10, %11 : vector<8x256xi32>
    %c16_i32 = arith.constant 16 : i32
    %13 = vector.broadcast %c16_i32 : i32 to vector<8x256xi32>
    %14 = arith.shrui %12, %13 : vector<8x256xi32>
    %15 = arith.xori %12, %14 : vector<8x256xi32>
    %c2146121005_i32 = arith.constant 2146121005 : i32
    %16 = vector.broadcast %c2146121005_i32 : i32 to vector<8x256xi32>
    %17 = arith.muli %15, %16 : vector<8x256xi32>
    %c15_i32 = arith.constant 15 : i32
    %18 = vector.broadcast %c15_i32 : i32 to vector<8x256xi32>
    %19 = arith.shrui %17, %18 : vector<8x256xi32>
    %20 = arith.xori %17, %19 : vector<8x256xi32>
    %c-2073254261_i32 = arith.constant -2073254261 : i32
    %21 = vector.broadcast %c-2073254261_i32 : i32 to vector<8x256xi32>
    %22 = arith.muli %20, %21 : vector<8x256xi32>
    %c16_i32_4 = arith.constant 16 : i32
    %23 = vector.broadcast %c16_i32_4 : i32 to vector<8x256xi32>
    %24 = arith.shrui %22, %23 : vector<8x256xi32>
    %25 = arith.xori %22, %24 : vector<8x256xi32>
    %c8_i32 = arith.constant 8 : i32
    %26 = vector.broadcast %c8_i32 : i32 to vector<8x256xi32>
    %27 = arith.shrui %25, %26 : vector<8x256xi32>
    %28 = arith.sitofp %27 : vector<8x256xi32> to vector<8x256xf32>
    %c128_i32 = arith.constant 128 : i32
    %29 = vector.broadcast %c128_i32 : i32 to vector<8x256xi32>
    %30 = arith.andi %25, %29 : vector<8x256xi32>
    %c0_i32 = arith.constant 0 : i32
    %31 = vector.broadcast %c0_i32 : i32 to vector<8x256xi32>
    %32 = arith.cmpi eq, %30, %31 : vector<8x256xi32>
    %33 = arith.mulf %0, %1 : vector<8x256xf32>
    %34 = arith.mulf %33, %28 : vector<8x256xf32>
    %cst = arith.constant 1.1920929E-7 : f32
    %35 = vector.broadcast %cst : f32 to vector<8x256xf32>
    %36 = arith.mulf %34, %35 : vector<8x256xf32>
    %cst_5 = arith.constant 0.000000e+00 : f32
    %37 = vector.broadcast %cst_5 : f32 to vector<8x256xf32>
    %38 = arith.select %32, %36, %37 : vector<8x256xi1>, vector<8x256xf32>
    %cst_6 = arith.constant 5.000000e-01 : f32
    %39 = vector.broadcast %cst_6 : f32 to vector<8x256xf32>
    %40 = arith.mulf %39, %38 : vector<8x256xf32>
    %cst_7 = arith.constant 0.707106769 : f32
    %41 = vector.broadcast %cst_7 : f32 to vector<8x256xf32>
    %42 = arith.mulf %38, %41 : vector<8x256xf32>
    %43 = math.erf %42 : vector<8x256xf32>
    %cst_8 = arith.constant 1.000000e+00 : f32
    %44 = vector.broadcast %cst_8 : f32 to vector<8x256xf32>
    %45 = arith.addf %44, %43 : vector<8x256xf32>
    %46 = arith.mulf %40, %45 : vector<8x256xf32>
    %c0_9 = arith.constant 0 : index
    %c0_10 = arith.constant 0 : index
    %47 = vector.load %arg4[%c0_9, %c0_10] : memref<8x256xf32, #tpu.memory_space<vmem>>, vector<8x256xf32>
    tpu.vector_store %arg4[%c0_9, %c0_10], %46 {strides = array<i32>} : memref<8x256xf32, #tpu.memory_space<vmem>>, vector<8x256xf32>,
    return
  }
  func.func @transform_0(%arg0: i32) -> i32 {
    %c0_i32 = arith.constant 0 : i32
    %c0_i32_0 = arith.constant 0 : i32
    return %c0_i32 : i32
  }
  func.func @transform_1(%arg0: i32) -> (i32, i32) {
    %c0_i32 = arith.constant 0 : i32
    %c0_i32_0 = arith.constant 0 : i32
    return %arg0, %c0_i32 : i32, i32
  }
  func.func @transform_2(%arg0: i32) -> (i32, i32) {
    %c0_i32 = arith.constant 0 : i32
    %c0_i32_0 = arith.constant 0 : i32
    return %arg0, %c0_i32 : i32, i32
  }
  func.func @transform_3(%arg0: i32) -> (i32, i32) {
    %c0_i32 = arith.constant 0 : i32
    %c0_i32_0 = arith.constant 0 : i32
    return %arg0, %c0_i32 : i32, i32
  }
}

</mosaic_0001>

<bundles_post_ra>
// kernel: tpu_custom_call.1
= control target key start
LH: loop header
LB: loop body
LE: loop exit
PB: predicated region body
PF: predicated region fallthrough
CT: control target
= control target key end

     0   :  { %9 = vsyncpa [#allocation4], 0  ;;  %s261_s0 = inlined_call_operand.<no memory space> [shape: s32[1], index: 0, kind: input, shape index: {}]   ;;  %s262_s1 = inlined_call_operand.hbm [shape: f32[8,256], index: 1, kind: input, shape index: {}]   ;;  %s263_s2 = inlined_call_operand.hbm [shape: f32[8,256], index: 2, kind: input, shape index: {}]   ;;  %s264_s3 = inlined_call_operand.hbm [shape: f32[8,256], index: 3, kind: output, shape index: {}]  }
   0x1   :  { %10 = vsyncpa [#allocation7], 0 }
   0x2   :  { %11 = vsyncpa [#allocation5], 0  ;;  %s199_s12 = smov [#allocation3]   ;;  %s200_s14 = smov [#allocation6]  }
   0x3   :  { %s20_s13 = sshll.u32 %s199_s12, 4  ;;  %s30_s15 = sshll.u32 %s200_s14, 4  ;;  %s21_s13 = int_to_ptr.vmem [resolvable:$true] %s20_s13  ;;  %s31_s15 = int_to_ptr.vmem [resolvable:$true] %s30_s15 }
   0x4   :  { %s127_s18 = scalar_lea.hbm %s262_s1, 256 }
   0x5   :  { %p128_p0 = scmp.ne.s32.totalorder %s262_s1, %s127_s18  ;;  %p131_p1 = scmp.lt.u32.totalorder %s127_s18, %s262_s1 }
   0x7   :  { %p133_p2 = pnand %p131_p1, %p128_p0 }
   0x9   :  { %136 = shalt.err (!%p133_p2)
}
   0xa   :  { %s137_s23 = scalar_lea.vmem %s21_s13, 256  ;;  %p142_p4 = scmp.lt.s32.totalorder %s21_s13, %s21_s13 }
   0xb   :  { %p138_p3 = scmp.ne.s32.totalorder %s21_s13, %s137_s23  ;;  %p143_p5 = scmp.lt.s32.totalorder %s137_s23, %s137_s23 }
   0xd   :  { %p144_p6 = por %p143_p5, %p142_p4 }
   0xf   :  { %p145_p7 = pnand %p144_p6, %p138_p3 }
  0x11   :  { %148 = shalt.err (!%p145_p7)
}
  0x12   :  { %23 = dma.hbm_to_vmem [thread:$0]  %s262_s1, 256, %s21_s13, [#allocation4]  }
  0x13   :  { %s149_s28 = scalar_lea.hbm %s263_s2, 256 }
  0x14   :  { %p150_p8 = scmp.ne.s32.totalorder %s263_s2, %s149_s28  ;;  %p153_p9 = scmp.lt.u32.totalorder %s149_s28, %s263_s2 }
  0x16   :  { %p155_p10 = pnand %p153_p9, %p150_p8 }
  0x18   :  { %158 = shalt.err (!%p155_p10)
}
  0x19   :  { %s159_s6 = scalar_lea.vmem %s31_s15, 256  ;;  %p164_p12 = scmp.lt.s32.totalorder %s31_s15, %s31_s15 }
  0x1a   :  { %p160_p11 = scmp.ne.s32.totalorder %s31_s15, %s159_s6  ;;  %p165_p13 = scmp.lt.s32.totalorder %s159_s6, %s159_s6 }
  0x1c   :  { %p166_p0 = por %p165_p13, %p164_p12 }
  0x1e   :  { %p167_p1 = pnand %p166_p0, %p160_p11 }
  0x20   :  { %170 = shalt.err (!%p167_p1)
}
  0x21   :  { %33 = dma.hbm_to_vmem [thread:$0]  %s263_s2, 256, %s31_s15, [#allocation7]  }
  0x22   :  { %193 = dma.done.wait [#allocation4], 256  }
  0x23   :  { %194 = vsyncadd [#allocation4], 4294967040 }
  0x24   :  { %195 = dma.done.wait [#allocation7], 256  }
  0x25   :  { %196 = vsyncadd [#allocation7], 4294967040  ;;  %v44_v0 = vlaneseq  ;;  %v57_v5 = vstv %s261_s0  ;;  %v40_v22 = vld [vmem:[#allocation3] sm:$0xff]  ;;  %v42_v25 = vld [vmem:[#allocation6] sm:$0xff]  ;;  %s201_s0 = smov [#allocation8]  }
  0x26   :  { %v41_v26 = vld [vmem:[#allocation3 + $0x8] sm:$0xff]  ;;  %v43_v27 = vld [vmem:[#allocation6 + $0x8] sm:$0xff]  ;;  %v84_v31 = vmul.f32 %v42_v25, %v40_v22  ;;  %s110_s2 = sshll.u32 %s201_s0, 4  ;;  %s111_s2 = int_to_ptr.vmem [resolvable:$true] %s110_s2 }
  0x27   :  { %v45_v1 = vshrl.u32 %v44_v0, 7  ;;  %v47_v2 = vand.u32 127, %v44_v0  ;;  %v85_v33 = vmul.f32 %v43_v27, %v41_v26  ;;  %s171_s10 = scalar_lea.vmem %s111_s2, 256  ;;  %p176_p3 = scmp.lt.s32.totalorder %s111_s2, %s111_s2 }
  0x28   :  { %p172_p2 = scmp.ne.s32.totalorder %s111_s2, %s171_s10  ;;  %p177_p4 = scmp.lt.s32.totalorder %s171_s10, %s171_s10 }
  0x29   :  { %v49_v3 = vmul.u32 256, %v45_v1  ;;  %v48_v4 = vadd.s32 128, %v47_v2 }
  0x2a   :  { %p178_p5 = por %p177_p4, %p176_p3 }
  0x2b   :  { %v50_v6 = vadd.s32 %v49_v3, %v47_v2  ;;  %v51_v7 = vadd.s32 %v49_v3, %v48_v4 }
  0x2c   :  { %p179_p6 = pnand %p178_p5, %p172_p2 }
  0x2d   :  { %v58_v8 = vadd.s32 %v57_v5, %v50_v6  ;;  %v59_v9 = vadd.s32 %v57_v5, %v51_v7 }
  0x2f   :  { %v60_v10 = vshrl.u32 %v58_v8, 16  ;;  %v61_v11 = vshrl.u32 %v59_v9, 16 }
  0x31   :  { %v62_v12 = vxor.u32 %v60_v10, %v58_v8  ;;  %v63_v13 = vxor.u32 %v61_v11, %v59_v9 }
  0x33   :  { %v64_v14 = vmul.u32 2146121005, %v62_v12  ;;  %v65_v15 = vmul.u32 2146121005, %v63_v13 }
  0x35   :  { %v66_v16 = vshrl.u32 %v64_v14, 15  ;;  %v67_v17 = vshrl.u32 %v65_v15, 15 }
  0x37   :  { %v68_v18 = vxor.u32 %v66_v16, %v64_v14  ;;  %v69_v19 = vxor.u32 %v67_v17, %v65_v15 }
  0x39   :  { %v70_v20 = vmul.u32 2221713035, %v68_v18  ;;  %v71_v21 = vmul.u32 2221713035, %v69_v19 }
  0x3b   :  { %v72_v23 = vshrl.u32 %v70_v20, 16  ;;  %v73_v24 = vshrl.u32 %v71_v21, 16 }
  0x3d   :  { %v74_v28 = vxor.u32 %v72_v23, %v70_v20  ;;  %v75_v29 = vxor.u32 %v73_v24, %v71_v21 }
  0x3f   :  { %v76_v30 = vshrl.u32 %v74_v28, 8  ;;  %v77_v32 = vshrl.u32 %v75_v29, 8  ;;  %v80_v34 = vand.u32 128, %v74_v28  ;;  %v81_v35 = vand.u32 128, %v75_v29 }
  0x41   :  { %v78_v36 = vcvt.s32.f32 %v76_v30  ;;  %v79_v37 = vcvt.s32.f32 %v77_v32  ;;  %vm82_vm0 = vcmp.eq.s32.totalorder %v80_v34, 0  ;;  %vm83_vm1 = vcmp.eq.s32.totalorder %v81_v35, 0 }
  0x43   :  { %v86_v38 = vmul.f32 %v84_v31, %v78_v36  ;;  %v87_v39 = vmul.f32 %v85_v33, %v79_v37 }
  0x45   :  { %v88_v40 = vmul.f32 1.1920929e-07, %v86_v38  ;;  %v89_v41 = vmul.f32 1.1920929e-07, %v87_v39 }
  0x47   :  { %v90_v42 = vsel %vm82_vm0, %v88_v40, 0.0  ;;  %v91_v43 = vsel %vm83_vm1, %v89_v41, 0.0 }
  0x48   :  { %v94_v44 = vmul.f32 0.70710677, %v90_v42  ;;  %v95_v45 = vmul.f32 0.70710677, %v91_v43  ;;  %v92_v46 = vmul.f32 0.5, %v90_v42  ;;  %v93_v48 = vmul.f32 0.5, %v91_v43 }
  0x4a   :  { %123 = verf.f32 %v94_v44 }
  0x4b   :  { %125 = verf.f32 %v95_v45 }
  0x54   :  { %v124_v47 = vpop.eup %123 }
  0x55   :  { %v126_v49 = vpop.eup %125  ;;  %v98_v50 = vadd.f32 1.0, %v124_v47 }
  0x56   :  { %v99_v51 = vadd.f32 1.0, %v126_v49 }
  0x57   :  { %v100_v52 = vmul.f32 %v98_v50, %v92_v46 }
  0x58   :  { %v101_v53 = vmul.f32 %v99_v51, %v93_v48 }
  0x59   :  { %102 = vst [vmem:[#allocation8] sm:$0xff] %v100_v52 }
  0x5a   :  { %103 = vst [vmem:[#allocation8 + $0x8] sm:$0xff] %v101_v53 }
  0x5b   :  { %182 = shalt.err (!%p179_p6)
}
  0x5c   :  { %s183_s13 = scalar_lea.hbm %s264_s3, 256 }
  0x5d   :  { %p184_p7 = scmp.ne.s32.totalorder %s264_s3, %s183_s13  ;;  %p187_p8 = scmp.lt.u32.totalorder %s183_s13, %s264_s3 }
  0x5f   :  { %p189_p9 = pnand %p187_p8, %p184_p7 }
  0x61   :  { %192 = shalt.err (!%p189_p9)
}
  0x62   :  { %113 = dma.vmem_to_hbm [thread:$0]  %s111_s2, 256, %s264_s3, [#allocation5]  }
  0x63   :  { %197 = dma.done.wait [#allocation5], 256  }
  0x64   :  { %198 = vsyncadd [#allocation5], 4294967040 }
  0x65   :  { %117 = vsyncpa [#allocation4], 1 }
  0x66   :  { %118 = vsyncpa [#allocation7], 1 }
  0x67   :  { %119 = vsyncpa [#allocation5], 1 }

</bundles_post_ra>
